<compile_context>
chip_gen: v6e
topology: v6e:2x2x1
jax: 0.10.0
libtpu: 0.0.40
codegen_flags: <defaults>
</compile_context>

<pallas_src>
import math
import functools

import jax
import jax.numpy as jnp
import numpy as np
from jax import lax
from jax.experimental import pallas as pl
from jax.experimental.pallas import tpu as pltpu


@functools.lru_cache(maxsize=None)
def _vmem_limit_bytes():
    """Generation-aware scoped-VMEM budget (v5e/v6e: 128 MiB, v7x: 64 MiB)."""
    try:
        cap = int(pltpu.get_tpu_info().vmem_capacity_bytes)
    except Exception:
        cap = 64 * 1024 * 1024
    # Leave ~45% headroom for compiler-internal scratch / double-buffering slack.
    return max(32 * 1024 * 1024, int(cap * 0.55))


def _pick_tile(dim, preferred, align):
    """Largest tile <= preferred that divides `dim` and is `align`-aligned.

    Falls back to 8-alignment, then to the full dim (full-dim blocks are always
    legal BlockSpec blocks)."""
    preferred = min(preferred, dim)
    if preferred == dim:
        return dim
    t = (preferred // align) * align
    while t >= align:
        if dim % t == 0:
            return t
        t -= align
    if align > 8:
        return _pick_tile(dim, preferred, 8)
    return dim


# ----------------------------------------------------------------------------
# Kernel 1: tiled QKV projection  qkv[s] = x @ W3[s] + b3[s]   (s = 0:q, 1:k, 2:v)
# ----------------------------------------------------------------------------
def _qkv_linear_kernel(x_ref, w_ref, b_ref, o_ref, acc_ref):
    k_idx = pl.program_id(3)

    @pl.when(k_idx == 0)
    def _():
        acc_ref[...] = jnp.zeros_like(acc_ref)

    # bf16 MXU operands, f32 accumulation.
    acc_ref[...] += jnp.dot(x_ref[...].astype(jnp.bfloat16),
                            w_ref[0].astype(jnp.bfloat16),
                            preferred_element_type=jnp.float32)

    @pl.when(k_idx == pl.num_programs(3) - 1)
    def _():
        o_ref[0] = (acc_ref[...] + b_ref[0]).astype(o_ref.dtype)


def qkv_projection(x2d, w3, b3, *, out_dtype, bm=512, bn=512, bk=1024):
    """x2d: (M, K); w3: (3, K, N) bf16; b3: (3, 1, N) f32 -> (3, M, N) out_dtype."""
    M, K = x2d.shape
    N = w3.shape[2]
    tm = _pick_tile(M, bm, 16)
    tn = _pick_tile(N, bn, 128)
    tk = _pick_tile(K, bk, 128)
    grid = (3, M // tm, N // tn, K // tk)
    return pl.pallas_call(
        _qkv_linear_kernel,
        out_shape=jax.ShapeDtypeStruct((3, M, N), out_dtype),
        grid=grid,
        in_specs=[
            pl.BlockSpec((tm, tk), lambda s, i, j, k: (i, k)),
            pl.BlockSpec((1, tk, tn), lambda s, i, j, k: (s, k, j)),
            pl.BlockSpec((1, 1, tn), lambda s, i, j, k: (s, 0, j)),
        ],
        out_specs=pl.BlockSpec((1, tm, tn), lambda s, i, j, k: (s, i, j)),
        scratch_shapes=[pltpu.VMEM((tm, tn), jnp.float32)],
        compiler_params=pltpu.CompilerParams(
            dimension_semantics=("parallel", "parallel", "parallel", "arbitrary"),
            vmem_limit_bytes=_vmem_limit_bytes(),
        ),
    )(x2d, w3, b3)


# ----------------------------------------------------------------------------
# Kernel 2: flash-style causal attention over all heads of a q tile
#   grid = (B, T//tq, T//tkv), kv axis last ("arbitrary"), online softmax.
#   Softmax scale is pre-folded into W_q (no per-step multiply here).
# ----------------------------------------------------------------------------
def _flash_attn_kernel(q_ref, k_ref, v_ref, o_ref, m_sc, l_sc, acc_sc, *,
                       n_head, head_dim, block_q, block_kv):
    qi = pl.program_id(1)
    ki = pl.program_id(2)

    @pl.when(ki == 0)
    def _():
        m_sc[...] = jnp.full_like(m_sc, -jnp.inf)
        l_sc[...] = jnp.zeros_like(l_sc)
        acc_sc[...] = jnp.zeros_like(acc_sc)

    q_start = qi * block_q
    kv_start = ki * block_kv

    def attend(apply_mask):
        q = q_ref[0, 0].astype(jnp.bfloat16)      # (block_q,  C)
        k = k_ref[0, 0].astype(jnp.bfloat16)      # (block_kv, C)
        v = v_ref[0, 0].astype(jnp.bfloat16)      # (block_kv, C)
        if apply_mask:
            rows = q_start + lax.broadcasted_iota(jnp.int32, (block_q, block_kv), 0)
            cols = kv_start + lax.broadcasted_iota(jnp.int32, (block_q, block_kv), 1)
            causal = cols <= rows
        for h in range(n_head):
            lo = h * head_dim
            hi = lo + head_dim
            # q @ k^T without materializing a transpose: contract the head dim.
            s = lax.dot_general(q[:, lo:hi], k[:, lo:hi],
                                (((1,), (1,)), ((), ())),
                                preferred_element_type=jnp.float32)
            if apply_mask:
                s = jnp.where(causal, s, -jnp.inf)
            m_prev = m_sc[h]                                     # (block_q, 1)
            m_new = jnp.maximum(m_prev, jnp.max(s, axis=-1, keepdims=True))
            alpha = jnp.exp(m_prev - m_new)
            p = jnp.exp(s - m_new)
            l_sc[h] = alpha * l_sc[h] + jnp.sum(p, axis=-1, keepdims=True)
            acc_sc[:, lo:hi] = alpha * acc_sc[:, lo:hi] + jnp.dot(
                p.astype(jnp.bfloat16), v[:, lo:hi],
                preferred_element_type=jnp.float32)
            m_sc[h] = m_new

    # Skip kv tiles entirely above the diagonal; only mask tiles touching it.
    needs_compute = kv_start < q_start + block_q
    needs_mask = (kv_start + block_kv - 1) > q_start

    @pl.when(needs_compute & needs_mask)
    def _():
        attend(True)

    @pl.when(needs_compute & jnp.logical_not(needs_mask))
    def _():
        attend(False)

    @pl.when(ki == pl.num_programs(2) - 1)
    def _():
        inv_l = pl.reciprocal(l_sc[...], approx=True)            # (n_head, block_q, 1)
        for h in range(n_head):
            lo = h * head_dim
            hi = lo + head_dim
            acc_sc[:, lo:hi] = acc_sc[:, lo:hi] * inv_l[h]
        # Single lane-dense (block_q, C) store: heads already merged in acc layout.
        o_ref[0] = acc_sc[...].astype(o_ref.dtype)


def flash_causal_attention(qkv, n_head, *, block_q=512, block_kv=256):
    """qkv: (3, B, T, C) -> (B, T, C) head-merged attention output (qkv.dtype)."""
    _, B, T, C = qkv.shape
    head_dim = C // n_head
    tq = _pick_tile(T, block_q, 16)
    tkv = _pick_tile(T, block_kv, 128)
    kernel = functools.partial(_flash_attn_kernel, n_head=n_head, head_dim=head_dim,
                               block_q=tq, block_kv=tkv)

    def q_map(b, qi, ki):
        return (0, b, qi, 0)

    def make_kv_map(which):
        def kv_map(b, qi, ki):
            # Clamp the kv block index to the last block intersecting the causal
            # region of this q tile; repeated block index => Pallas skips the DMA.
            last_needed = ((qi + 1) * tq - 1) // tkv
            return (which, b, jnp.minimum(ki, last_needed), 0)
        return kv_map

    # NOTE: for v7x megacore make sure B * (T // tq) >= 2 so both TensorCores get work.
    return pl.pallas_call(
        kernel,
        out_shape=jax.ShapeDtypeStruct((B, T, C), qkv.dtype),
        grid=(B, T // tq, T // tkv),
        in_specs=[
            pl.BlockSpec((1, 1, tq, C), q_map),
            pl.BlockSpec((1, 1, tkv, C), make_kv_map(1)),
            pl.BlockSpec((1, 1, tkv, C), make_kv_map(2)),
        ],
        out_specs=pl.BlockSpec((1, tq, C), lambda b, qi, ki: (b, qi, 0)),
        scratch_shapes=[
            pltpu.VMEM((n_head, tq, 1), jnp.float32),   # running max m_i
            pltpu.VMEM((n_head, tq, 1), jnp.float32),   # running denom l_i
            pltpu.VMEM((tq, C), jnp.float32),           # output accumulator (lane-dense)
        ],
        compiler_params=pltpu.CompilerParams(
            dimension_semantics=("parallel", "parallel", "arbitrary"),
            vmem_limit_bytes=_vmem_limit_bytes(),
        ),
    )(qkv, qkv, qkv)


# ----------------------------------------------------------------------------
# Kernel 3: tiled output projection + residual:  out = y @ W + b + residual
# ----------------------------------------------------------------------------
def _proj_residual_kernel(y_ref, w_ref, b_ref, r_ref, o_ref, acc_ref):
    k_idx = pl.program_id(2)

    @pl.when(k_idx == 0)
    def _():
        acc_ref[...] = jnp.zeros_like(acc_ref)

    acc_ref[...] += jnp.dot(y_ref[...].astype(jnp.bfloat16),
                            w_ref[...].astype(jnp.bfloat16),
                            preferred_element_type=jnp.float32)

    @pl.when(k_idx == pl.num_programs(2) - 1)
    def _():
        o_ref[...] = (acc_ref[...] + b_ref[...]
                      + r_ref[...].astype(jnp.float32)).astype(o_ref.dtype)


def proj_residual(y2d, w_in_out, b, resid2d, *, out_dtype, bm=512, bn=512, bk=1024):
    M, K = y2d.shape
    N = w_in_out.shape[1]
    tm = _pick_tile(M, bm, 16)
    tn = _pick_tile(N, bn, 128)
    tk = _pick_tile(K, bk, 128)
    grid = (M // tm, N // tn, K // tk)
    return pl.pallas_call(
        _proj_residual_kernel,
        out_shape=jax.ShapeDtypeStruct((M, N), out_dtype),
        grid=grid,
        in_specs=[
            pl.BlockSpec((tm, tk), lambda i, j, k: (i, k)),
            pl.BlockSpec((tk, tn), lambda i, j, k: (k, j)),
            pl.BlockSpec((1, tn), lambda i, j, k: (0, j)),
            pl.BlockSpec((tm, tn), lambda i, j, k: (i, j)),
        ],
        out_specs=pl.BlockSpec((tm, tn), lambda i, j, k: (i, j)),
        scratch_shapes=[pltpu.VMEM((tm, tn), jnp.float32)],
        compiler_params=pltpu.CompilerParams(
            dimension_semantics=("parallel", "parallel", "arbitrary"),
            vmem_limit_bytes=_vmem_limit_bytes(),
        ),
    )(y2d, w_in_out, b, resid2d)


# ----------------------------------------------------------------------------
# One-time parameter prep (weight re-layout, scale folding, bf16 cast)
# ----------------------------------------------------------------------------
def prepare_params(params, n_head, param_dtype=jnp.bfloat16):
    C = params["w_proj"].shape[0]
    head_dim = C // n_head
    scale = 1.0 / math.sqrt(head_dim)
    # c_attn weights as (3, in, out); PyTorch Linear stores (out, in).
    w3 = params["w_attn"].astype(jnp.float32).reshape(3, C, C).transpose(0, 2, 1)
    b3 = params["b_attn"].astype(jnp.float32).reshape(3, 1, C)
    # Fold the 1/sqrt(head_dim) softmax scale into the q projection.
    w3 = w3.at[0].multiply(scale)
    b3 = b3.at[0].multiply(scale)
    return {
        "w3": w3.astype(param_dtype),                              # (3, C, C) bf16
        "b3": b3,                                                  # (3, 1, C) f32
        "w_proj_t": params["w_proj"].T.astype(param_dtype),        # (C, C)   bf16
        "b_proj": params["b_proj"].astype(jnp.float32).reshape(1, C),
    }


# ----------------------------------------------------------------------------
# Full forward pass (glue in plain JAX, hot paths in Pallas)
# ----------------------------------------------------------------------------
def causal_self_attention_forward(x, residual, prepared, n_head, *,
                                  block_m=512, block_n=512, block_k=1024,
                                  block_q=512, block_kv=256,
                                  intermediate_dtype=jnp.bfloat16):
    B, T, C = x.shape
    assert C % n_head == 0

    qkv = qkv_projection(x.reshape(B * T, C), prepared["w3"], prepared["b3"],
                         out_dtype=intermediate_dtype,
                         bm=block_m, bn=block_n, bk=block_k)       # (3, B*T, C)
    qkv = qkv.reshape(3, B, T, C)                                  # free reshape

    # attn_dropout: eval mode -> p = 0 -> identity.
    y = flash_causal_attention(qkv, n_head,
                               block_q=block_q, block_kv=block_kv)  # (B, T, C)

    # c_proj + resid_dropout (eval -> identity) + residual, fused.
    out = proj_residual(y.reshape(B * T, C),
                        prepared["w_proj_t"],
                        prepared["b_proj"],
                        residual.reshape(B * T, C),
                        out_dtype=x.dtype,
                        bm=block_m, bn=block_n, bk=block_k)
    return out.reshape(B, T, C)
    # TODO(synk): training-mode dropout (attn_dropout / resid_dropout) and the
    # decode()/KV-cache path are not implemented; eval-mode forward only.


# ----------------------------------------------------------------------------
# Pure-JAX reference for correctness check
# ----------------------------------------------------------------------------
def reference_forward(x, residual, params, n_head):
    B, T, C = x.shape
    hd = C // n_head
    qkv = x @ params["w_attn"].T + params["b_attn"]
    q, k, v = jnp.split(qkv, 3, axis=2)
    q = q.reshape(B, T, n_head, hd).transpose(0, 2, 1, 3)
    k = k.reshape(B, T, n_head, hd).transpose(0, 2, 1, 3)
    v = v.reshape(B, T, n_head, hd).transpose(0, 2, 1, 3)
    s = jnp.einsum("bhqd,bhkd->bhqk", q, k) / math.sqrt(hd)
    mask = jnp.tril(jnp.ones((T, T), dtype=bool))
    s = jnp.where(mask[None, None], s, -jnp.inf)
    p = jax.nn.softmax(s, axis=-1)
    y = jnp.einsum("bhqk,bhkd->bhqd", p, v)
    y = y.transpose(0, 2, 1, 3).reshape(B, T, C)
    return y @ params["w_proj"].T + params["b_proj"] + residual


if __name__ == "__main__":
    # Small config consistent with the module (n_embd % n_head == 0, head_dim=64).
    B, T, C, n_head = 2, 32, 256, 4

    key = jax.random.PRNGKey(0)
    kx, kr, k1, k2, k3, k4 = jax.random.split(key, 6)

    x = jax.random.normal(kx, (B, T, C), dtype=jnp.float32)
    residual = jax.random.normal(kr, (B, T, C), dtype=jnp.float32)

    # Deterministic parameter init (PyTorch Linear convention: (out, in))
    params = {
        "w_attn": jax.random.normal(k1, (3 * C, C), dtype=jnp.float32) * 0.02,
        "b_attn": jax.random.normal(k2, (3 * C,), dtype=jnp.float32) * 0.02,
        "w_proj": jax.random.normal(k3, (C, C), dtype=jnp.float32) * 0.02,
        "b_proj": jax.random.normal(k4, (C,), dtype=jnp.float32) * 0.02,
    }
    prepared = prepare_params(params, n_head)   # one-time weight re-layout / bf16 cast

    # Small block sizes so this test exercises multi-tile K accumulation, the
    # online-softmax loop over kv tiles, causal block skipping, and both the
    # masked (diagonal) and unmasked (interior) attention branches.
    out = causal_self_attention_forward(
        x, residual, prepared, n_head,
        block_m=32, block_n=128, block_k=128, block_q=16, block_kv=16)
    out = jax.block_until_ready(out)

    ref = reference_forward(x, residual, params, n_head)
    # bf16 MXU operands + bf16 intermediates + approx reciprocal => loosened tolerance.
    np.testing.assert_allclose(np.asarray(out, dtype=np.float32), np.asarray(ref),
                               rtol=2e-2, atol=2e-2)

    print("KERNEL_OK")
</pallas_src>

<mosaic_0001>
module attributes {stable_mosaic.version = 11 : i64} {
  func.func @_qkv_linear_kernel(%arg0: i32, %arg1: i32, %arg2: i32, %arg3: i32, %arg4: memref<32x128xf32, #tpu.memory_space<vmem>>, %arg5: memref<1x128x128xbf16, #tpu.memory_space<vmem>>, %arg6: memref<1x1x128xf32, #tpu.memory_space<vmem>>, %arg7: memref<1x32x128xbf16, #tpu.memory_space<vmem>>, %arg8: memref<32x128xf32, #tpu.memory_space<vmem>>) attributes {dimension_semantics = [#tpu.dimension_semantics<parallel>, #tpu.dimension_semantics<parallel>, #tpu.dimension_semantics<parallel>, #tpu.dimension_semantics<arbitrary>], iteration_bounds = array<i64: 3, 2, 2, 2>, scalar_prefetch = 0 : i64, scratch_operands = 1 : i64, tpu.core_type = #tpu.core_type<tc>, window_params = [{transform_indices = @transform_0, window_bounds = array<i64: 32, 128>}, {transform_indices = @transform_1, window_bounds = array<i64: 1, 128, 128>}, {transform_indices = @transform_2, window_bounds = array<i64: 1, 1, 128>}, {transform_indices = @transform_3, window_bounds = array<i64: 1, 32, 128>}]} {
    %c0_i32 = arith.constant 0 : i32
    %0 = arith.cmpi eq, %arg3, %c0_i32 : i32
    %1 = arith.extui %0 : i1 to i32
    %c0_i32_0 = arith.constant 0 : i32
    %2 = arith.cmpi ne, %1, %c0_i32_0 : i32
    scf.if %2 {
      %cst_10 = arith.constant 0.000000e+00 : f32
      %14 = vector.broadcast %cst_10 : f32 to vector<32x128xf32>
      %c0_11 = arith.constant 0 : index
      %c0_12 = arith.constant 0 : index
      %15 = vector.load %arg8[%c0_11, %c0_12] : memref<32x128xf32, #tpu.memory_space<vmem>>, vector<32x128xf32>
      tpu.vector_store %arg8[%c0_11, %c0_12], %14 {strides = array<i32>} : memref<32x128xf32, #tpu.memory_space<vmem>>, vector<32x128xf32>,
    } else {
    }
    %c0 = arith.constant 0 : index
    %c0_1 = arith.constant 0 : index
    %3 = vector.load %arg8[%c0, %c0_1] : memref<32x128xf32, #tpu.memory_space<vmem>>, vector<32x128xf32>
    %c0_2 = arith.constant 0 : index
    %c0_3 = arith.constant 0 : index
    %4 = vector.load %arg4[%c0_2, %c0_3] : memref<32x128xf32, #tpu.memory_space<vmem>>, vector<32x128xf32>
    %5 = arith.truncf %4 : vector<32x128xf32> to vector<32x128xbf16>
    %c0_4 = arith.constant 0 : index
    %c0_5 = arith.constant 0 : index
    %c0_6 = arith.constant 0 : index
    %6 = vector.load %arg5[%c0_4, %c0_5, %c0_6] : memref<1x128x128xbf16, #tpu.memory_space<vmem>>, vector<1x128x128xbf16>
    %7 = vector.shape_cast %6 : vector<1x128x128xbf16> to vector<128x128xbf16>
    %cst = arith.constant dense<0.000000e+00> : vector<32x128xf32>
    %8 = tpu.matmul %5, %7, %cst {dimension_numbers = #tpu.dot_dimension_numbers<[1], [0], [0], [1], [0, 0, 1, 1], [], []>} : vector<32x128xbf16>, vector<128x128xbf16>, vector<32x128xf32> -> vector<32x128xf32>
    %9 = arith.addf %3, %8 : vector<32x128xf32>
    %c0_7 = arith.constant 0 : index
    %c0_8 = arith.constant 0 : index
    %10 = vector.load %arg8[%c0_7, %c0_8] : memref<32x128xf32, #tpu.memory_space<vmem>>, vector<32x128xf32>
    tpu.vector_store %arg8[%c0_7, %c0_8], %9 {strides = array<i32>} : memref<32x128xf32, #tpu.memory_space<vmem>>, vector<32x128xf32>,
    %c1_i32 = arith.constant 1 : i32
    %11 = arith.cmpi eq, %arg3, %c1_i32 : i32
    %12 = arith.extui %11 : i1 to i32
    %c0_i32_9 = arith.constant 0 : i32
    %13 = arith.cmpi ne, %12, %c0_i32_9 : i32
    scf.if %13 {
      %c0_10 = arith.constant 0 : index
      %c0_11 = arith.constant 0 : index
      %14 = vector.load %arg8[%c0_10, %c0_11] : memref<32x128xf32, #tpu.memory_space<vmem>>, vector<32x128xf32>
      %c0_12 = arith.constant 0 : index
      %c0_13 = arith.constant 0 : index
      %c0_14 = arith.constant 0 : index
      %15 = vector.load %arg6[%c0_12, %c0_13, %c0_14] : memref<1x1x128xf32, #tpu.memory_space<vmem>>, vector<1x1x128xf32>
      %16 = vector.shape_cast %15 : vector<1x1x128xf32> to vector<1x128xf32>
      %17 = vector.broadcast %16 : vector<1x128xf32> to vector<32x128xf32>
      %18 = arith.addf %14, %17 : vector<32x128xf32>
      %19 = arith.truncf %18 : vector<32x128xf32> to vector<32x128xbf16>
      %c0_15 = arith.constant 0 : index
      %c0_16 = arith.constant 0 : index
      %c0_17 = arith.constant 0 : index
      %20 = vector.load %arg7[%c0_15, %c0_16, %c0_17] : memref<1x32x128xbf16, #tpu.memory_space<vmem>>, vector<1x32x128xbf16>
      %21 = vector.shape_cast %20 : vector<1x32x128xbf16> to vector<32x128xbf16>
      %22 = vector.shape_cast %19 : vector<32x128xbf16> to vector<1x32x128xbf16>
      tpu.vector_store %arg7[%c0_15, %c0_16, %c0_17], %22 {strides = array<i32>} : memref<1x32x128xbf16, #tpu.memory_space<vmem>>, vector<1x32x128xbf16>,
    } else {
    }
    return
  }
  func.func @transform_0(%arg0: i32, %arg1: i32, %arg2: i32, %arg3: i32) -> (i32, i32) {
    %c0_i32 = arith.constant 0 : i32
    return %arg1, %arg3 : i32, i32
  }
  func.func @transform_1(%arg0: i32, %arg1: i32, %arg2: i32, %arg3: i32) -> (i32, i32, i32) {
    %c0_i32 = arith.constant 0 : i32
    return %arg0, %arg3, %arg2 : i32, i32, i32
  }
  func.func @transform_2(%arg0: i32, %arg1: i32, %arg2: i32, %arg3: i32) -> (i32, i32, i32) {
    %c0_i32 = arith.constant 0 : i32
    %c0_i32_0 = arith.constant 0 : i32
    return %arg0, %c0_i32, %arg2 : i32, i32, i32
  }
  func.func @transform_3(%arg0: i32, %arg1: i32, %arg2: i32, %arg3: i32) -> (i32, i32, i32) {
    %c0_i32 = arith.constant 0 : i32
    return %arg0, %arg1, %arg2 : i32, i32, i32
  }
}

</mosaic_0001>

<bundles_post_ra>
// kernel: tpu_custom_call.1
= control target key start
LH: loop header
LB: loop body
LE: loop exit
PB: predicated region body
PF: predicated region fallthrough
CT: control target
= control target key end

     0   :  { %s1740_s0 = inlined_call_operand.hbm [shape: f32[64,256], index: 0, kind: input, shape index: {}]   ;;  %s1741_s1 = inlined_call_operand.hbm [shape: bf16[3,256,256], index: 1, kind: input, shape index: {}]   ;;  %s1742_s2 = inlined_call_operand.hbm [shape: f32[3,1,256], index: 2, kind: input, shape index: {}]   ;;  %s1743_s3 = inlined_call_operand.hbm [shape: bf16[3,64,256], index: 3, kind: output, shape index: {}]  }
   0x1   :  { %1764 = sst [smem:[#allocation34_spill]] %s1740_s0 }
   0x2   :  { %1765 = sst [smem:[#allocation35_spill]] %s1741_s1 }
   0x3   :  { %1766 = sst [smem:[#allocation36_spill]] %s1742_s2 }
   0x4   :  { %1767 = sst [smem:[#allocation37_spill]] %s1743_s3 }
   0x5   :  { %8 = vsyncpa [#allocation4], 0 }
   0x6   :  { %10 = vsyncpa [#allocation4 + $0x1], 0 }
   0x7   :  { %11 = vsyncpa [#allocation7], 0 }
   0x8   :  { %13 = vsyncpa [#allocation7 + $0x1], 0 }
   0x9   :  { %14 = vsyncpa [#allocation5], 0 }
   0xa   :  { %16 = vsyncpa [#allocation5 + $0x1], 0  ;;  %s1279_s12 = smov 0   ;;  %s1281_s13 = smov 0  }
   0xb   :  { %s1283_s14 = smov 0   ;;  %s1285_s15 = smov 0  }
   0xc   :  { %s1287_s16 = smov 0   ;;  %s1289_s17 = smov 0  }
   0xd   :  { %s1291_s18 = smov 0   ;;  %s1293_s19 = smov 0  }
   0xe   :  { %s1295_s20 = smov 0   ;;  %s1297_s21 = smov 0  }
   0xf   :  { %s1299_s22 = smov 0   ;;  %s1301_s23 = smov 0  }
  0x10   :  { %s1303_s24 = smov 0   ;;  %s1305_s25 = smov 0  }
  0x11   :  { %s1307_s26 = smov 0   ;;  %s1309_s27 = smov 0  }
  0x12   :  { %s1311_s28 = smov 0   ;;  %s1313_s29 = smov 0  }
  0x13   :  { %s1315_s30 = smov 0   ;;  %s1317_s4 = smov 0  }
  0x14   :  { %s1319_s5 = smov 0  }
  0x15 LB: > { %1768 = sst [smem:[#allocation14_spill]] %s1164_s12  ;;  %s37_s6 = sadd.s32 1, %s1228_s28  ;;  %s1244_s5 = sphi %s1319_s5, %s22_s5   ;;  %s1240_s4 = sphi %s1317_s4, %s1859_s4   ;;  %s1236_s30 = sphi %s1315_s30, %s1858_s30   ;;  %s1232_s29 = sphi %s1313_s29, %s1857_s29   ;;  %s1228_s28 = sphi %s1311_s28, %s1856_s28   ;;  %s1224_s27 = sphi %s1309_s27, %s1840_s27   ;;  %s1220_s26 = sphi %s1307_s26, %s1855_s26   ;;  %s1216_s25 = sphi %s1305_s25, %s1839_s25   ;;  %s1212_s24 = sphi %s1303_s24, %s1854_s24   ;;  %s1208_s23 = sphi %s1301_s23, %s1838_s23   ;;  %s1204_s22 = sphi %s1299_s22, %s1853_s22   ;;  %s1200_s21 = sphi %s1297_s21, %s1852_s21   ;;  %s1196_s20 = sphi %s1295_s20, %s1851_s20   ;;  %s1192_s19 = sphi %s1293_s19, %s1850_s19   ;;  %s1188_s18 = sphi %s1291_s18, %s1836_s18   ;;  %s1184_s17 = sphi %s1289_s17, %s1848_s17   ;;  %s1180_s16 = sphi %s1287_s16, %s1847_s16   ;;  %s1176_s15 = sphi %s1285_s15, %s1835_s15   ;;  %s1172_s14 = sphi %s1283_s14, %s1844_s14   ;;  %s1168_s13 = sphi %s1281_s13, %s1842_s13   ;;  %s1164_s12 = sphi %s1279_s12, %s1834_s12  }
  0x16   : > { %1769 = sst [smem:[#allocation15_spill]] %s1168_s13  ;;  %s40_s7 = sadd.s32 1, %s1232_s29 }
  0x17   : > { %1770 = sst [smem:[#allocation16_spill]] %s1176_s15  ;;  %p38_p0 = scmp.ge.s32.totalorder %s37_s6, 2 }
  0x18   : > { %1771 = sst [smem:[#allocation17_spill]] %s1180_s16  ;;  %p1760_p1 = scmp.eq.s32.totalorder %s1244_s5, 0 }
  0x19   : > { %1772 = sst [smem:[#allocation18_spill]] %s1188_s18  ;;  %s1861_s6 = smov (%p38_p0, %s37_s6), 0 }
  0x1a   : > { %1773 = sst [smem:[#allocation19_spill]] %s1192_s19  ;;  %s1863_s7 = smov (!%p38_p0, %s40_s7), %s1232_s29 }
  0x1b   : > { %1774 = sst [smem:[#allocation20_spill]] %s1208_s23  ;;  %s1396_s10 = ssub.s32 %s1228_s28, %s1861_s6 }
  0x1c   : > { %1775 = sst [smem:[#allocation21_spill]] %s1212_s24  ;;  %p94_p2 = scmp.ne.s32.totalorder %s1196_s20, %s1192_s19 }
  0x1d   : > { %1776 = sst [smem:[#allocation22_spill]] %s1216_s25  ;;  %p42_p3 = scmp.ge.s32.totalorder %s1863_s7, 2 }
  0x1e   : > { %1777 = sst [smem:[#allocation23_spill]] %s1220_s26  ;;  %p100_p4 = scmp.ne.s32.totalorder %s1192_s19, %s1188_s18 }
  0x1f   : > { %1778 = sst [smem:[#allocation24_spill]] %s1224_s27  ;;  %p1405_p5 = por %p94_p2, %p1760_p1 }
  0x20   : > { %1779 = sst [smem:[#allocation25_spill]] %s1232_s29  ;;  %p1761_p6 = scmp.lt.s32.totalorder %s1244_s5, 24 }
  0x21   : > { %1780 = sst [smem:[#allocation26_spill]] %s1240_s4  ;;  %s205_s3 = sand.u32 1, %s1244_s5  }
  0x22   : > { %1781 = sst [smem:[#allocation27_spill]] %s1861_s6  ;;  %s207_s6 = sand.u32 1, %s1196_s20  }
  0x23   : > { %s1412_s9 = scalar_select %p42_p3, 0, %s1863_s7  }
  0x24   : > { %s662_s27 = sshll.u32 %s207_s6, 6  ;;  %s696_s25 = sshll.u32 %s1228_s28, 5 }
  0x25   : > { %1783 = sst [smem:[#allocation28_spill]] %s1412_s9  ;;  %s1417_s8 = ssub.s32 %s1232_s29, %s1412_s9 }
  0x26   : > { %s215_s26 = sadd.s32 %s1232_s29, %s696_s25  ;;  %s665_s24 = sshll.u32 %s1240_s4, 6 }
  0x27   : > { %s209_s2 = scalar_lea.vmem [#allocation6], %s662_s27  ;;  %s217_s13 = sadd.s32 %s665_s24, %s215_s26 }
  0x28   : > { %s220_s12 = sshll.u32 %s209_s2, 4  ;;  %s666_s15 = sshll.u32 %s217_s13, 6  ;;  %s221_s12 = int_to_ptr.vmem [resolvable:$true] %s220_s12 }
  0x29   : > { %p1428_p7 = pnand %p1761_p6, %p1405_p5  ;;  %s1785_s1 = sld [smem:[#allocation35_spill]] }
  0x2a   : > { %s1435_s6 = scalar_lea.sflag [#allocation7], %s205_s3  ;;  %s965_s25 = scalar_lea.vmem %s221_s12, 1024 }
  0x2b   : > { %1786 = sst [smem:[#allocation29_spill]] %s1435_s6  ;;  %p954_p8 = pneg %p1428_p7 }
  0x2c   : > { %p966_p9 = scmp.ne.s32.totalorder %s221_s12, %s965_s25  ;;  %s1246_s2 = smov [#allocation6]  }
  0x2d   : > { %s970_s13 = sshll.u32 %s1246_s2, 4  ;;  %s971_s13 = int_to_ptr.vmem [resolvable:$false] %s970_s13 }
  0x2e   : > { %p968_p10 = pnand %p966_p9, %p954_p8  ;;  %s972_s24 = scalar_lea.vmem %s971_s13, 2048 }
  0x2f   : > { %s219_s19 = scalar_lea.hbm %s1785_s1, %s666_s15  ;;  %p973_p12 = scmp.lt.s32.totalorder %s221_s12, %s971_s13 }
  0x30   : > { %p969_p11 = pneg %p968_p10  ;;  %p974_p13 = scmp.lt.s32.totalorder %s972_s24, %s965_s25 }
  0x32   : > { %p975_p0 = por %p974_p13, %p973_p12 }
  0x34   : > { %p976_p2 = pnand %p975_p0, %p969_p11 }
  0x36   : > { %979 = shalt.err (!%p976_p2)
}
  0x37   : > { %s1752_s18 = smov 128   ;;  %s1248_s3 = smov 64  }
  0x38   : > { %s1249_s15 = smov 4   ;;  %p669_p5 = scmp.ge.s32.totalorder %s1244_s5, 1 }
  0x39   : > { %757 = dma.hbm_to_vmem [thread:$0]  (!%p1428_p7), %s219_s19, 1024, %s221_s12, %s1435_s6, %s1752_s18, %s1248_s3, %s1249_s15  }
  0x3a   : > { %p247_p8 = scmp.lt.s32.totalorder %s1244_s5, 25  ;;  %s44_s27 = sadd.s32 1, %s1236_s30 }
  0x3b   : > { %s1865_s27 = smov (!%p42_p3, %s44_s27), %s1236_s30  ;;  %s57_s9 = sadd.s32 1, %s1208_s23 }
  0x3c   : > { %p1445_p9 = pnand %p669_p5, %p247_p8  ;;  %p64_p10 = scmp.ne.s32.totalorder %s1208_s23, %s1204_s22 }
  0x3d   : > { %p46_p11 = scmp.ge.s32.totalorder %s1865_s27, 2  ;;  %p70_p12 = scmp.ne.s32.totalorder %s1204_s22, %s1200_s21 }
  0x3e   : > { %s1787_s26 = scalar_select %p1445_p9, 1, 0 }
  0x3f   : > { %p1460_p7 = por %p1760_p1, %p64_p10  ;;  %s145_s16 = sadd.s32 1, %s1172_s14 }
  0x40   : > { %1788 = sst [smem:[#allocation30_spill]] %s1787_s26  ;;  %s1867_s27 = smov (%p46_p11, %s1865_s27), 0 }
  0x41   : > { %1790 = sst [smem:[#allocation31_spill]] %s1867_s27  ;;  %s1791_s19 = sadd.s32 1, %s1240_s4 }
  0x42   : > { %s1869_s19 = smov (!%p46_p11, %s1791_s19), %s1240_s4  ;;  %s52_s7 = ssub.s32 %s1236_s30, %s1867_s27 }
  0x43   : > { %s182_s11 = sand.u32 1, %s1208_s23   ;;  %p50_p3 = scmp.ge.s32.totalorder %s1869_s19, 3 }
  0x44   : > { %s54_s25 = sor.u32 %s1396_s10, %s52_s7  ;;  %s658_s24 = sshll.u32 %s182_s11, 5 }
  0x45   : > { %p55_p13 = scmp.eq.s32.totalorder %s54_s25, 0  ;;  %s1871_s19 = smov (%p50_p3, %s1869_s19), 0 }
  0x46   : > { %1792 = sst [smem:[#allocation32_spill]] %s1871_s19  ;;  %s1481_s13 = ssub.s32 %s1240_s4, %s1871_s19 }
  0x47   : > { %s1477_s2 = scalar_select %p55_p13, %s1208_s23, %s57_s9  }
  0x48   : > { %s82_s3 = sor.u32 %s1481_s13, %s1396_s10  ;;  %s140_s15 = sor.u32 %s1481_s13, %s52_s7 }
  0x49   : > { %1793 = sst [smem:[#allocation33_spill]] %s1477_s2  ;;  %s84_s18 = sor.u32 %s1417_s8, %s82_s3 }
  0x4a   : > { %s142_s1 = sor.u32 %s140_s15, %s1417_s8  ;;  %p85_p0 = scmp.eq.s32.totalorder %s84_s18, 0 }
  0x4b   : > { %p143_p2 = scmp.eq.s32.totalorder %s142_s1, 0  ;;  %s695_s27 = sshll.u32 %s1236_s30, 3 }
  0x4c   : > { %s1794_s25 = sadd.s32 1, %s1196_s20  ;;  %s192_s9 = sadd.s32 %s1228_s28, %s695_s27 }
  0x4d   : > { %s1492_s26 = scalar_select %p85_p0, %s1196_s20, %s1794_s25  }
  0x4e   : > { %s1495_s6 = scalar_select %p143_p2, %s1172_s14, %s145_s16  }
  0x4f   : > { %s186_s19 = scalar_lea.vmem [#allocation3], %s658_s24  ;;  %s661_s23 = sshll.u32 %s192_s9, 7 }
  0x50   : > { %s195_s2 = sshll.u32 %s186_s19, 4  ;;  %s1795_s0 = sld [smem:[#allocation34_spill]]  ;;  %s196_s2 = int_to_ptr.vmem [resolvable:$true] %s195_s2 }
  0x51   : > { %p1505_p5 = pnand %p1761_p6, %p1460_p7  ;;  %s183_s1 = scalar_lea.sflag [#allocation4], %s182_s11 }
  0x52   : > { %s993_s16 = scalar_lea.vmem %s196_s2, 512  ;;  %s1250_s27 = smov [#allocation3]  }
  0x53   : > { %p982_p8 = pneg %p1505_p5  ;;  %p994_p10 = scmp.ne.s32.totalorder %s196_s2, %s993_s16 }
  0x54   : > { %s998_s19 = sshll.u32 %s1250_s27, 4  ;;  %s999_s19 = int_to_ptr.vmem [resolvable:$false] %s998_s19 }
  0x55   : > { %p996_p11 = pnand %p994_p10, %p982_p8  ;;  %s1000_s7 = scalar_lea.vmem %s999_s19, 1024 }
  0x56   : > { %s194_s10 = scalar_lea.hbm %s1795_s0, %s661_s23  ;;  %p1001_p13 = scmp.lt.s32.totalorder %s196_s2, %s999_s19 }
  0x57   : > { %p997_p3 = pneg %p996_p11  ;;  %p1002_p0 = scmp.lt.s32.totalorder %s1000_s7, %s993_s16 }
  0x59   : > { %p1003_p2 = por %p1002_p0, %p1001_p13 }
  0x5b   : > { %p1004_p1 = pnand %p1003_p2, %p997_p3 }
  0x5d   : > { %1007 = shalt.err (!%p1004_p1)
}
  0x5e   : > { %s1251_s23 = smov 256   ;;  %s1799_s12 = sld [smem:[#allocation17_spill]] }
  0x5f   : > { %s1800_s11 = sld [smem:[#allocation16_spill]]  ;;  %s1252_s3 = smov 8  }
  0x60   : > { %s1801_s24 = sld [smem:[#allocation15_spill]]  ;;  %s1802_s15 = smov 128  }
  0x61   : > { %754 = dma.hbm_to_vmem [thread:$0]  (!%p1505_p5), %s194_s10, 512, %s196_s2, %s183_s1, %s1251_s23, %s1802_s15, %s1252_s3  }
  0x62   : > { %s1803_s25 = sld [smem:[#allocation14_spill]]  ;;  %s1515_s9 = sadd.s32 4294967295, %s1244_s5  }
  0x63   : > { %s655_s16 = sadd.s32 4294967294, %s1244_s5   ;;  %p71_p1 = scmp.eq.s32.totalorder %s1515_s9, 0 }
  0x64   : > { %s112_s27 = sor.u32 %s1417_s8, %s1481_s13  ;;  %s115_s19 = sadd.s32 1, %s1184_s17 }
  0x65   : > { %s1804_s7 = sld [smem:[#allocation26_spill]]  ;;  %p1525_p7 = por %p71_p1, %p70_p12 }
  0x66   : > { %s1806_s18 = sld [smem:[#allocation25_spill]]  ;;  %p1532_p5 = por %p100_p4, %p71_p1 }
  0x67   : > { %p113_p8 = scmp.eq.s32.totalorder %s112_s27, 0  ;;  %p122_p10 = scmp.ne.s32.totalorder %s1184_s17, %s1799_s12 }
  0x68   : > { %s1807_s2 = scalar_select %p1532_p5, 1, 0 }
  0x69   : > { %p128_p11 = scmp.ne.s32.totalorder %s1799_s12, %s1800_s11  ;;  %p155_p3 = scmp.ne.s32.totalorder %s1172_s14, %s1801_s24 }
  0x6a   : > { %s1543_s10 = scalar_select %p113_p8, %s1184_s17, %s115_s19  }
  0x6b   : > { %p1808_p13 = scmp.eq.s32.totalorder %s1244_s5, 0  ;;  %p1551_p12 = por %p128_p11, %p71_p1 }
  0x6c   : > { %p156_p4 = scmp.eq.s32.totalorder %s1515_s9, 23  ;;  %p161_p2 = scmp.ne.s32.totalorder %s1801_s24, %s1803_s25 }
  0x6d   : > { %p1547_p0 = por %p122_p10, %p1808_p13  ;;  %p162_p6 = scmp.eq.s32.totalorder %s655_s16, 23 }
  0x6e   : > { %s232_s13 = sand.u32 1, %s1184_s17   ;;  %p1559_p5 = por %p156_p4, %p155_p3 }
  0x6f   : > { %p1563_p8 = por %p162_p6, %p161_p2  ;;  %s667_s29 = sshll.u32 %s1804_s7, 1 }
  0x70   : > { %s1811_s1 = scalar_select %p1559_p5, 1, 0 }
  0x71   : > { %s1812_s23 = scalar_select %p1563_p8, 1, 0 }
  0x72   : > { %s238_s4 = sadd.s32 %s1806_s18, %s667_s29  ;;  %s233_s12 = scalar_lea.vmem [#allocation8], %s232_s13 }
  0x73   : > { %s242_s11 = sshll.u32 %s233_s12, 4  ;;  %s668_s3 = sshll.u32 %s238_s4, 4  ;;  %s243_s11 = int_to_ptr.vmem [resolvable:$true] %s242_s11 }
  0x74   : > { %s1813_s19 = sld [smem:[#allocation36_spill]]  ;;  %p1814_p1 = scmp.lt.s32.totalorder %s1244_s5, 24 }
  0x75   : > { %s1021_s16 = scalar_lea.vmem %s243_s11, 16  ;;  %s1253_s7 = smov [#allocation8]  }
  0x76   : > { %p1576_p10 = pnand %p1814_p1, %p1547_p0  ;;  %p1022_p11 = scmp.ne.s32.totalorder %s243_s11, %s1021_s16 }
  0x77   : > { %s1026_s18 = sshll.u32 %s1253_s7, 4  ;;  %s1027_s18 = int_to_ptr.vmem [resolvable:$false] %s1026_s18 }
  0x78   : > { %p1010_p6 = pneg %p1576_p10  ;;  %s1028_s13 = scalar_lea.vmem %s1027_s18, 32 }
  0x79   : > { %p1029_p4 = scmp.lt.s32.totalorder %s243_s11, %s1027_s18  ;;  %p1030_p2 = scmp.lt.s32.totalorder %s1028_s13, %s1021_s16 }
  0x7a   : > { %s240_s24 = scalar_lea.hbm %s1813_s19, %s668_s3  ;;  %p1024_p3 = pnand %p1022_p11, %p1010_p6 }
  0x7b   : > { %p1031_p8 = por %p1030_p2, %p1029_p4 }
  0x7c   : > { %p1025_p13 = pneg %p1024_p3 }
  0x7e   : > { %p1032_p5 = pnand %p1031_p8, %p1025_p13 }
  0x80   : > { %1035 = shalt.err (!%p1032_p5)
}
  0x81   : > { %s1816_s21 = sld [smem:[#allocation29_spill]]  ;;  %s253_s4 = sand.u32 (!%p1445_p9), 1, %s1204_s22  }
  0x82   : > { %s670_s12 = sshll.u32 (!%p1445_p9), %s253_s4, 5  ;;  %s254_s3 = scalar_lea.sflag (!%p1445_p9), [#allocation4], %s253_s4 }
  0x83   : > { %251 = sbr.rel (%p1445_p9) target bundleno = 452 (0x1c4), region = 32  ;;  %s1588_s15 = scalar_lea.vmem (!%p1445_p9), [#allocation3], %s670_s12 }
  0x87   : > { %760 = dma.hbm_to_vmem [thread:$0]  (!%p1576_p10), %s240_s24, 16, %s243_s11, %s1816_s21  }
  0x88   : > { %1147 = dma.done.wait (%p1525_p7), %s254_s3, 512  }
  0x89   : > { %1149 = vsyncadd (%p1525_p7), %s254_s3, 4294966784  ;;  %s1818_s27 = sld [smem:[#allocation19_spill]]  ;;  %s262_s19 = sand.u32 1, %s1515_s9  }
  0x8a   : > { %s263_s25 = scalar_lea.sflag [#allocation7], %s262_s19  ;;  %p1819_p9 = scmp.ne.s32.totalorder %s1807_s2, 0 }
  0x8f   : > { %s264_s11 = sand.u32 1, %s1818_s27  }
  0x90   : > { %s671_s24 = sshll.u32 %s264_s11, 6 }
  0x91   : > { %s1596_s16 = scalar_lea.vmem [#allocation6], %s671_s24 }
  0x92   : > { %1151 = dma.done.wait (%p1819_p9), %s263_s25, 1024  }
  0x93   : > { %1153 = vsyncadd (%p1819_p9), %s263_s25, 4294966272  ;;  %s1820_s7 = sld [smem:[#allocation17_spill]] }
  0x99   : > { %s273_s18 = sand.u32 1, %s1820_s7  }
  0x9a   : > { %s1603_s13 = scalar_lea.vmem [#allocation8], %s273_s18 }
  0x9b   : > { %1155 = dma.done.wait (%p1551_p12), %s263_s25, 16  }
  0x9c   : > { %1157 = vsyncadd (%p1551_p12), %s263_s25, 4294967280  ;;  %s1821_s0 = sld [smem:[#allocation15_spill]] }
  0x9d   : > { %s1822_s4 = sld [smem:[#allocation21_spill]] }
  0xa2   : > { %s303_s9 = sand.u32 1, %s1821_s0  }
  0xa3   : > { %s672_s21 = sshll.u32 %s303_s9, 4  ;;  %p673_p7 = scmp.ne.s32.totalorder %s1822_s4, 0 }
  0xa4   : > { %s1612_s29 = scalar_lea.vmem [#allocation9], %s672_s21 }
  0xa5   : > { %313 = sbr.rel (%p673_p7) target bundleno = 173 (0xad), region = 48 }
  0xaa   : > { %v1254_v0 = vmov 0.0  }
  0xab   : > { %314 = vst [vmem:[#allocation2 + $0x10] sm:$0xff] %v1254_v0  ;;  %315 = vst [vmem:[#allocation2] sm:$0xff] %v1254_v0 }
  0xac   : > { %316 = vst [vmem:[#allocation2 + $0x18] sm:$0xff] %v1254_v0  ;;  %317 = vst [vmem:[#allocation2 + $0x8] sm:$0xff] %v1254_v0 }
  0xad PF: > { %v944_v1 = vld [vmem:[%s1596_s16 + $0x38] sm:$0xff]   ;;  %v945_v2 = vld [vmem:[%s1596_s16 + $0x30] sm:$0xff]   ;;  %v946_v3 = vld [vmem:[%s1596_s16 + $0x28] sm:$0xff]   ;;  %s1823_s2 = sld [smem:[#allocation21_spill]] }
  0xae   : > { %723 = vmatprep.subr.bf16.mxu0 %v944_v1  ;;  %v947_v4 = vld [vmem:[%s1596_s16 + $0x20] sm:$0xff]   ;;  %v323_v6 = vld [vmem:[%s1588_s15 + $0x8] sm:$0xff]  ;;  %v948_v8 = vld [vmem:[%s1596_s16 + $0x18] sm:$0xff]  }
  0xaf   : > { %724 = vmatpush3.bf16.msra.mxu0 %v944_v1  ;;  %v322_v5 = vld [vmem:[%s1588_s15] sm:$0xff]  ;;  %v949_v9 = vld [vmem:[%s1596_s16 + $0x10] sm:$0xff]   ;;  %v950_v10 = vld [vmem:[%s1596_s16 + $0x8] sm:$0xff]  }
  0xb0   : > { %725 = vmatprep.subr.bf16.mxu0 %v945_v2  ;;  %v326_v7 = vpack.c.bf16 %v323_v6, %v322_v5  ;;  %v951_v11 = vld [vmem:[%s1596_s16] sm:$0xff]   ;;  %v324_v12 = vld [vmem:[%s1588_s15 + $0x10] sm:$0xff]  ;;  %v325_v13 = vld [vmem:[%s1588_s15 + $0x18] sm:$0xff] }
  0xb1   : > { %v327_v14 = vpack.c.bf16 %v325_v13, %v324_v12 }
  0xb2   : > { %739 = vmatprep.mubr.bf16.mxu0 %v326_v7  ;;  %v318_v17 = vld [vmem:[#allocation2 + $0x10] sm:$0xff]  ;;  %v319_v23 = vld [vmem:[#allocation2] sm:$0xff] }
  0xb3   : > { %726 = vmatpush3.bf16.msra.mxu0 %v945_v2  ;;  %v320_v15 = vld [vmem:[#allocation2 + $0x18] sm:$0xff]  ;;  %v321_v20 = vld [vmem:[#allocation2 + $0x8] sm:$0xff]  ;;  %p682_p5 = scmp.ne.s32.totalorder %s1823_s2, 1 }
  0xb4   : > { %727 = vmatprep.subr.bf16.mxu0 %v946_v3 }
  0xb7   : > { %728 = vmatpush3.bf16.msra.mxu0 %v946_v3 }
  0xb8   : > { %729 = vmatprep.subr.bf16.mxu0 %v947_v4 }
  0xbb   : > { %730 = vmatpush3.bf16.msra.mxu0 %v947_v4 }
  0xbc   : > { %731 = vmatprep.subr.bf16.mxu0 %v948_v8 }
  0xbf   : > { %732 = vmatpush3.bf16.msra.mxu0 %v948_v8 }
  0xc0   : > { %733 = vmatprep.subr.bf16.mxu0 %v949_v9 }
  0xc3   : > { %734 = vmatpush3.bf16.msra.mxu0 %v949_v9 }
  0xc4   : > { %735 = vmatprep.subr.bf16.mxu0 %v950_v10 }
  0xc7   : > { %736 = vmatpush3.bf16.msra.mxu0 %v950_v10 }
  0xc8   : > { %737 = vmatprep.subr.bf16.mxu0 %v951_v11 }
  0xcb   : > { %738 = vmatpush3.bf16.msra.mxu0 %v951_v11 }
  0xce   : > { %740 = vmatmul.mubr.bf16.vlgmr.msra.gmra.mxu0 %v327_v14 }
 0x18e   : > { %v741_v16 = vpop.f32.mrf.mxu0 }
 0x18f   : > { %v443_v18 = vadd.f32 %v741_v16, %v320_v15 }
 0x190   : > { %v426_v19 = vpop.f32.mrf.mxu0 }
 0x191   : > { %447 = vst [vmem:[#allocation2 + $0x18] sm:$0xff] %v443_v18  ;;  %v441_v21 = vadd.f32 %v426_v19, %v318_v17 }
 0x192   : > { %v742_v22 = vpop.f32.mrf.mxu0 }
 0x193   : > { %445 = vst [vmem:[#allocation2 + $0x10] sm:$0xff] %v441_v21  ;;  %v444_v24 = vadd.f32 %v742_v22, %v321_v20  ;;  %452 = sbr.rel (%p682_p5) target bundleno = 420 (0x1a4), region = 52 }
 0x194   : > { %v429_v25 = vpop.f32.mrf.mxu0 }
 0x195   : > { %448 = vst [vmem:[#allocation2 + $0x8] sm:$0xff] %v444_v24  ;;  %v442_v26 = vadd.f32 %v429_v25, %v319_v23 }
 0x197   : > { %446 = vst [vmem:[#allocation2] sm:$0xff] %v442_v26 }
 0x198   : > { %v683_v29 = vld [vmem:[%s1603_s13] ss:$0 sm:$0xff]  ;;  %v455_v32 = vld [vmem:[#allocation2 + $0x18] sm:$0xff] }
 0x199   : > { %v466_v34 = vadd.f32 %v683_v29, %v455_v32 }
 0x19a   : > { %v453_v27 = vld [vmem:[#allocation2 + $0x10] sm:$0xff] }
 0x19b   : > { %v464_v30 = vadd.f32 %v683_v29, %v453_v27 }
 0x19c   : > { %v456_v33 = vld [vmem:[#allocation2 + $0x8] sm:$0xff] }
 0x19d   : > { %v467_v35 = vadd.f32 %v683_v29, %v456_v33 }
 0x19e   : > { %v454_v28 = vld [vmem:[#allocation2] sm:$0xff] }
 0x19f   : > { %v465_v31 = vadd.f32 %v683_v29, %v454_v28  ;;  %v710_v37 = vpack.c.bf16 %v467_v35, %v466_v34 }
 0x1a1   : > { %v705_v36 = vpack.c.bf16 %v465_v31, %v464_v30  ;;  %712 = vst [vmem:[%s1612_s29 + $0x8] sm:$0xff] %v710_v37  }
 0x1a3   : > { %706 = vst [vmem:[%s1612_s29] sm:$0xff] %v705_v36  }
 0x1a4 PF: > { %s1824_s8 = sld [smem:[#allocation23_spill]]  ;;  %s506_s25 = sshll.u32 %s1612_s29, 4  ;;  %s1635_s25 = int_to_ptr.vmem [resolvable:$true] %s506_s25 }
 0x1a5   : > { %s1825_s12 = sld [smem:[#allocation22_spill]]  ;;  %s1644_s4 = scalar_lea.sflag [#allocation5], %s303_s9 }
 0x1a6   : > { %s1826_s3 = sld [smem:[#allocation24_spill]]  ;;  %s1036_s2 = scalar_lea.vmem %s1635_s25, 256 }
 0x1a7   : > { %s1828_s13 = sld [smem:[#allocation37_spill]]  ;;  %p1037_p0 = scmp.ne.s32.totalorder %s1635_s25, %s1036_s2 }
 0x1a8   : > { %p1830_p12 = scmp.ne.s32.totalorder %s1811_s1, 0  ;;  %s1255_s29 = smov [#allocation9]  }
 0x1aa   : > { %s701_s27 = sshll.u32 %s1824_s8, 3  ;;  %p1038_p8 = pnand %p1037_p0, %p1830_p12 }
 0x1ab   : > { %s501_s19 = sadd.s32 %s1825_s12, %s701_s27  ;;  %s1040_s8 = sshll.u32 %s1255_s29, 4  ;;  %s1041_s8 = int_to_ptr.vmem [resolvable:$false] %s1040_s8 }
 0x1ac   : > { %s691_s11 = sshll.u32 %s1826_s3, 4  ;;  %p1039_p1 = pneg %p1038_p8 }
 0x1ad   : > { %s503_s24 = sadd.s32 %s691_s11, %s501_s19  ;;  %s1829_s0 = smov %s1828_s13 }
 0x1ae   : > { %s692_s16 = sshll.u32 %s503_s24, 6  ;;  %s1042_s12 = scalar_lea.vmem %s1041_s8, 512 }
 0x1af   : > { %s1640_s21 = scalar_lea.hbm %s1828_s13, %s692_s16  ;;  %p1043_p10 = scmp.lt.s32.totalorder %s1635_s25, %s1041_s8 }
 0x1b0   : > { %p1044_p6 = scmp.lt.s32.totalorder %s1042_s12, %s1036_s2 }
 0x1b2   : > { %p1045_p11 = por %p1044_p6, %p1043_p10 }
 0x1b4   : > { %p1046_p3 = pnand %p1045_p11, %p1039_p1 }
 0x1b6   : > { %1049 = shalt.err (!%p1046_p3)
}
 0x1b7   : > { %s1050_s9 = scalar_lea.hbm %s1640_s21, 256  ;;  %s1054_s27 = scalar_lea.hbm %s1829_s0, 3072 }
 0x1b8   : > { %p1051_p13 = scmp.ne.s32.totalorder %s1640_s21, %s1050_s9  ;;  %p1055_p9 = scmp.lt.s32.totalorder %s1640_s21, %s1829_s0 }
 0x1b9   : > { %p1056_p7 = scmp.lt.s32.totalorder %s1054_s27, %s1050_s9 }
 0x1ba   : > { %p1052_p4 = pnand %p1051_p13, %p1830_p12 }
 0x1bb   : > { %p1057_p5 = por %p1056_p7, %p1055_p9 }
 0x1bc   : > { %p1053_p2 = pneg %p1052_p4 }
 0x1be   : > { %p1058_p0 = pnand %p1057_p5, %p1053_p2 }
 0x1c0   : > { %1061 = shalt.err (!%p1058_p0)
}
 0x1c1   : > { %s1256_s24 = smov 64   ;;  %s1257_s16 = smov 128  }
 0x1c2   : > { %s1258_s7 = smov 4  }
 0x1c3   : > { %749 = dma.vmem_to_hbm [thread:$0]  (%p1830_p12), %s1635_s25, 256, %s1640_s21, %s1644_s4, %s1256_s24, %s1257_s16, %s1258_s7  }
 0x1c4 PF: > { %s1831_s18 = sld [smem:[#allocation14_spill]]  ;;  %p766_p8 = scmp.ge.s32.totalorder %s1244_s5, 2 }
 0x1c5   : > { %p1832_p1 = scmp.ne.s32.totalorder %s1812_s23, 0 }
 0x1c7   : > { %p762_p10 = pnand %p766_p8, %p1832_p1 }
 0x1c9   : > { %p763_p6 = pneg %p762_p10 }
 0x1ca   : > { %s521_s13 = sand.u32 1, %s1831_s18  }
 0x1cb   : > { %s522_s2 = scalar_lea.sflag [#allocation5], %s521_s13 }
 0x1cc   : > { %1159 = dma.done.wait (%p763_p6), %s522_s2, 256  }
 0x1cd   : > { %1161 = vsyncadd (%p763_p6), %s522_s2, 4294967040  ;;  %s22_s5 = sadd.s32 1, %s1244_s5   ;;  %s1834_s12 = sld [smem:[#allocation15_spill]] }
 0x1ce   : > { %p1672_p11 = scmp.ge.s32.totalorder %s22_s5, 26   ;;  %s1835_s15 = sld [smem:[#allocation17_spill]] }
 0x1cf   : > { %s1836_s18 = sld [smem:[#allocation19_spill]]  ;;  %s1842_s13 = smov %s1172_s14 }
 0x1d0   : > { %s1837_s1 = sld [smem:[#allocation20_spill]]  ;;  %s1844_s14 = smov %s1495_s6 }
 0x1d1   : > { %s1838_s23 = sld [smem:[#allocation33_spill]]  ;;  %s1847_s16 = smov %s1184_s17 }
 0x1d2   : > { %s1839_s25 = sld [smem:[#allocation25_spill]]  ;;  %s1848_s17 = smov %s1543_s10 }
 0x1d3   : > { %s1840_s27 = sld [smem:[#allocation26_spill]]  ;;  %s1850_s19 = smov %s1196_s20 }
 0x1d4   : > { %s1841_s4 = sld [smem:[#allocation27_spill]]  ;;  %s1851_s20 = smov %s1492_s26 }
 0x1d5   : > { %s1843_s8 = sld [smem:[#allocation28_spill]]  ;;  %s1852_s21 = smov %s1204_s22 }
 0x1d6   : > { %s1845_s9 = sld [smem:[#allocation31_spill]]  ;;  %s1853_s22 = smov %s1837_s1 }
 0x1d7   : > { %s1846_s3 = sld [smem:[#allocation32_spill]]  ;;  %s1854_s24 = smov %s1228_s28 }
 0x1d8   : > { %s1855_s26 = smov %s1236_s30 }
 0x1d9   :  { %21 = sbr.rel (!%p1672_p11) target bundleno = 21 (0x15), region = 109 }
 0x1da   : > { %s1856_s28 = smov %s1841_s4 }
 0x1db   : > { %s1857_s29 = smov %s1843_s8 }
 0x1dc   : > { %s1858_s30 = smov %s1845_s9 }
 0x1dd   : > { %s1859_s4 = smov %s1846_s3 }
 0x1de   :  { %527 = vsyncpa [#allocation4], 1 }
 0x1df   :  { %529 = vsyncpa [#allocation4 + $0x1], 1 }
 0x1e0   :  { %530 = vsyncpa [#allocation7], 1 }
 0x1e1   :  { %532 = vsyncpa [#allocation7 + $0x1], 1 }
 0x1e2   :  { %533 = vsyncpa [#allocation5], 1 }
 0x1e3   :  { %535 = vsyncpa [#allocation5 + $0x1], 1 }

</bundles_post_ra>
